<compile_context>
chip_gen: v5e
topology: v5e:2x2
jax: 0.10.0
libtpu: 0.0.40
codegen_flags: <defaults>
</compile_context>

<pallas_src>
import jax
import jax.numpy as jnp
from jax.experimental import pallas as pl
from jax.experimental.pallas import tpu as pltpu
from jax.scipy.linalg import block_diag

# Model dimensions (class_dis defaults).
POINT_SIZE = 2500          # loc vocabulary
TIM_SIZE = 24
LOC_EMB = 16
TIM_EMB = 16
INPUT_DIM = 5              # per-branch fc output width
HID = 16                   # hidden_dim
MAX_LEN = 10               # TrajLen cap
EMB_CAT = LOC_EMB + 2 * TIM_EMB       # 48 : concat(loc, arr, dur) embedding width

# Tiling: TB trajectories per grid step -> R = TB*MAX_LEN activation rows (multiple of 16,
# so bf16 sublane tiling is clean).  Tile footprint is a few KiB -> trivially fits VMEM on
# v5e/v6e (128 MiB) and v7x (64 MiB).
TB = 8
R = TB * MAX_LEN                      # 80


def _class_dis_kernel(e_ref,                            # [R, 48] bf16     concat embeddings
                      sel_ref,                          # [TB, R] f32      one-hot last-valid-row picker
                      wr1_ref, br1_ref,                 # [48,48] bf16, [1,48] f32   ResNet-1 (block-diag)
                      wr2_ref, br2_ref,                 # [48,48] bf16, [1,48] f32   ResNet-2 (block-diag)
                      wp_ref, bp_ref,                   # [48,16] bf16, [1,16] f32   Linear(16,5)x3 -> fc4 folded
                      wg_ref,                           # [16,96] bf16               bidir GRU input weights
                      brz_ref, bin_ref, bhn_ref,        # [1,64], [1,32], [1,32] f32 GRU biases
                      w5_ref, b5_ref,                   # [32,1] bf16, [1,1] f32     GRU2out
                      h_out_ref,                        # [R, 16] f32  forward GRU hidden per point
                      s_out_ref):                       # [TB, 1] f32  sigmoid score per trajectory
    f32 = jnp.float32
    bf16 = jnp.bfloat16

    e = e_ref[...]                                                          # [R,48] bf16

    # fc1/fc2/fc3 ResNet blocks, fused via block-diagonal weights over the 48-wide concat.
    # TODO(synk): ResNet assumed to be x + relu(Linear(d, d)(x)).
    h = e.astype(f32) + jnp.maximum(
        jnp.dot(e, wr1_ref[...], preferred_element_type=f32) + br1_ref[...], 0.0)
    h = h + jnp.maximum(
        jnp.dot(h.astype(bf16), wr2_ref[...], preferred_element_type=f32) + br2_ref[...], 0.0)

    # Per-branch Linear(16,5) -> concat -> fc4(15,16), algebraically folded into one matmul.
    p = jnp.dot(h.astype(bf16), wp_ref[...], preferred_element_type=f32) + bp_ref[...]   # [R,16]

    # Bidirectional GRU with seq_len == 1 and h0 == 0: one [R,16] x [16,96] matmul + gates.
    # Column layout of g: [r_fwd | r_rev | z_fwd | z_rev | n_fwd | n_rev], 16 each.
    g = jnp.dot(p.astype(bf16), wg_ref[...], preferred_element_type=f32)                 # [R,96]
    rz = jax.nn.sigmoid(g[:, 0:4 * HID] + brz_ref[...])                                  # [R,64]
    r = rz[:, 0:2 * HID]                                                                 # [R,32]
    z = rz[:, 2 * HID:4 * HID]                                                           # [R,32]
    n = jnp.tanh(g[:, 4 * HID:6 * HID] + bin_ref[...] + r * bhn_ref[...])                # [R,32]
    h_bi = (1.0 - z) * n                                  # [R,32]: cols 0:16 fwd, 16:32 rev

    # out.view(t_len, -1)[:, :hidden_dim] == forward-direction hidden per point.
    h_out_ref[...] = h_bi[:, 0:HID]

    # Vectorized "last valid point" pick: one-hot [TB,R] x [R,32] matmul (exact selection of
    # the bf16-rounded hidden), then GRU2out + sigmoid on TB rows only.
    h_last = jnp.dot(sel_ref[...].astype(bf16), h_bi.astype(bf16),
                     preferred_element_type=f32)                                          # [TB,32]
    s_out_ref[...] = jax.nn.sigmoid(
        jnp.dot(h_last.astype(bf16), w5_ref[...], preferred_element_type=f32) + b5_ref[...])


# --------------------------------------------------------------------------------------
# Parameters
# --------------------------------------------------------------------------------------
def init_params(key):
    """Unfused, f32, PyTorch-layout-like parameters."""
    def uni(k, shape, bound):
        return jax.random.uniform(k, shape, jnp.float32, -bound, bound)

    keys = iter(jax.random.split(key, 64))
    p = {}
    p['emb_loc'] = jax.random.normal(next(keys), (POINT_SIZE, LOC_EMB), jnp.float32)
    p['emb_arr'] = jax.random.normal(next(keys), (TIM_SIZE, TIM_EMB), jnp.float32)
    p['emb_dur'] = jax.random.normal(next(keys), (TIM_SIZE, TIM_EMB), jnp.float32)

    for name, d in (('fc1', LOC_EMB), ('fc2', TIM_EMB), ('fc3', TIM_EMB)):
        b = 1.0 / (d ** 0.5)
        p[f'{name}_wr1'] = uni(next(keys), (d, d), b)
        p[f'{name}_br1'] = uni(next(keys), (d,), b)
        p[f'{name}_wr2'] = uni(next(keys), (d, d), b)
        p[f'{name}_br2'] = uni(next(keys), (d,), b)
        p[f'{name}_wo'] = uni(next(keys), (d, INPUT_DIM), b)
        p[f'{name}_bo'] = uni(next(keys), (INPUT_DIM,), b)

    b4 = 1.0 / ((3 * INPUT_DIM) ** 0.5)
    p['fc4_w'] = uni(next(keys), (3 * INPUT_DIM, HID), b4)
    p['fc4_b'] = uni(next(keys), (HID,), b4)

    bg = 1.0 / (HID ** 0.5)
    for d in ('f', 'r'):                    # forward / reverse GRU direction
        for gate in ('r', 'z', 'n'):
            p[f'gru_{d}_wi{gate}'] = uni(next(keys), (HID, HID), bg)
            p[f'gru_{d}_bi{gate}'] = uni(next(keys), (HID,), bg)
            p[f'gru_{d}_bh{gate}'] = uni(next(keys), (HID,), bg)

    b5 = 1.0 / ((2 * HID) ** 0.5)
    p['w5'] = uni(next(keys), (2 * HID, 1), b5)
    p['b5'] = uni(next(keys), (1,), b5)
    return p


def pack_params(p):
    """Fuse per-branch / per-direction weights into the block-diagonal bf16 matrices the
    kernel consumes (done once, outside the hot path)."""
    bf16 = jnp.bfloat16
    wr1 = block_diag(p['fc1_wr1'], p['fc2_wr1'], p['fc3_wr1'])                    # [48,48]
    br1 = jnp.concatenate([p['fc1_br1'], p['fc2_br1'], p['fc3_br1']])
    wr2 = block_diag(p['fc1_wr2'], p['fc2_wr2'], p['fc3_wr2'])
    br2 = jnp.concatenate([p['fc1_br2'], p['fc2_br2'], p['fc3_br2']])
    wo = block_diag(p['fc1_wo'], p['fc2_wo'], p['fc3_wo'])                        # [48,15]
    bo = jnp.concatenate([p['fc1_bo'], p['fc2_bo'], p['fc3_bo']])                 # [15]
    wp = wo @ p['fc4_w']                                                          # [48,16]
    bp = bo @ p['fc4_w'] + p['fc4_b']                                             # [16]
    wg = jnp.concatenate([p['gru_f_wir'], p['gru_r_wir'],
                          p['gru_f_wiz'], p['gru_r_wiz'],
                          p['gru_f_win'], p['gru_r_win']], axis=1)                # [16,96]
    brz = jnp.concatenate([p['gru_f_bir'] + p['gru_f_bhr'], p['gru_r_bir'] + p['gru_r_bhr'],
                           p['gru_f_biz'] + p['gru_f_bhz'], p['gru_r_biz'] + p['gru_r_bhz']])
    b_in = jnp.concatenate([p['gru_f_bin'], p['gru_r_bin']])
    b_hn = jnp.concatenate([p['gru_f_bhn'], p['gru_r_bhn']])
    return {
        'emb_loc': p['emb_loc'], 'emb_arr': p['emb_arr'], 'emb_dur': p['emb_dur'],
        'wr1': wr1.astype(bf16), 'br1': br1.reshape(1, -1),
        'wr2': wr2.astype(bf16), 'br2': br2.reshape(1, -1),
        'wp': wp.astype(bf16), 'bp': bp.reshape(1, -1),
        'wg': wg.astype(bf16),
        'brz': brz.reshape(1, -1), 'bin': b_in.reshape(1, -1), 'bhn': b_hn.reshape(1, -1),
        'w5': p['w5'].astype(bf16), 'b5': p['b5'].reshape(1, 1),
    }


# --------------------------------------------------------------------------------------
# Forward wrapper (batched over trajectories — this is what pretrain()/reward() loop over)
# --------------------------------------------------------------------------------------
@jax.jit
def class_dis_forward(packed, x):
    """x: int32 [B, MAX_LEN, 3]; rows after the first loc-id == 0 are padding.

    Returns (s, h, t_len):
      s     [B]               sigmoid score (class_dis's first output, per trajectory)
      h     [B, MAX_LEN, HID] forward-GRU hidden per point; only [:t_len[b]] rows are meaningful
      t_len [B]               TrajLen per trajectory
    """
    B = x.shape[0]
    assert x.shape[1] == MAX_LEN and x.shape[2] == 3

    valid = (x[:, :, 0] != 0).astype(jnp.int32)
    t_len = jnp.sum(jnp.cumprod(valid, axis=1), axis=1).astype(jnp.int32)     # TrajLen

    # Embedding gather = trivial glue; done in plain JAX, cast once to bf16.
    e = jnp.concatenate([packed['emb_loc'][x[..., 0]],
                         packed['emb_arr'][x[..., 1]],
                         packed['emb_dur'][x[..., 2]]], axis=-1)              # [B, L, 48] f32
    e = e.reshape(B * MAX_LEN, EMB_CAT).astype(jnp.bfloat16)

    # One-hot selector of each trajectory's last valid row *within its tile* ([TB*MAX_LEN]
    # local rows).  The module assumes t_len >= 1; clamp for safety.
    last = jnp.maximum(t_len, 1) - 1                                          # [B]
    tgt = (jnp.arange(B) % TB) * MAX_LEN + last                               # local row index
    sel = (jnp.arange(R)[None, :] == tgt[:, None]).astype(jnp.float32)        # [B, R]

    # Pad the batch to a multiple of TB (padded trajectories produce discarded outputs).
    Bp = ((B + TB - 1) // TB) * TB
    if Bp != B:
        e = jnp.pad(e, ((0, (Bp - B) * MAX_LEN), (0, 0)))
        sel = jnp.pad(sel, ((0, Bp - B), (0, 0)))
    n_tiles = Bp // TB

    resident = lambda a: pl.BlockSpec(a.shape, lambda b: (0, 0))              # weights stay put

    grid_spec = pltpu.PrefetchScalarGridSpec(
        num_scalar_prefetch=0,
        grid=(n_tiles,),
        in_specs=[
            pl.BlockSpec((R, EMB_CAT), lambda b: (b, 0)),
            pl.BlockSpec((TB, R), lambda b: (b, 0)),
            resident(packed['wr1']), resident(packed['br1']),
            resident(packed['wr2']), resident(packed['br2']),
            resident(packed['wp']), resident(packed['bp']),
            resident(packed['wg']),
            resident(packed['brz']), resident(packed['bin']), resident(packed['bhn']),
            resident(packed['w5']), resident(packed['b5']),
        ],
        out_specs=[
            pl.BlockSpec((R, HID), lambda b: (b, 0)),
            pl.BlockSpec((TB, 1), lambda b: (b, 0)),
        ],
    )

    h_out, s_out = pl.pallas_call(
        _class_dis_kernel,
        out_shape=(jax.ShapeDtypeStruct((Bp * MAX_LEN, HID), jnp.float32),
                   jax.ShapeDtypeStruct((Bp, 1), jnp.float32)),
        grid_spec=grid_spec,
        compiler_params=pltpu.CompilerParams(dimension_semantics=("parallel",)),
    )(e, sel,
      packed['wr1'], packed['br1'], packed['wr2'], packed['br2'],
      packed['wp'], packed['bp'], packed['wg'],
      packed['brz'], packed['bin'], packed['bhn'],
      packed['w5'], packed['b5'])

    s = s_out[:B].reshape(B)
    h = h_out[:B * MAX_LEN].reshape(B, MAX_LEN, HID)
    return s, h, t_len


# --------------------------------------------------------------------------------------
# Pure-JAX f32 reference (mirrors the PyTorch module for a single trajectory)
# --------------------------------------------------------------------------------------
def class_dis_ref(p, xi, t_len):
    xs = xi[:t_len]

    def branch(e, name):
        h = e + jax.nn.relu(e @ p[f'{name}_wr1'] + p[f'{name}_br1'])
        h = h + jax.nn.relu(h @ p[f'{name}_wr2'] + p[f'{name}_br2'])
        return h @ p[f'{name}_wo'] + p[f'{name}_bo']

    loc = branch(p['emb_loc'][xs[:, 0]], 'fc1')
    arr = branch(p['emb_arr'][xs[:, 1]], 'fc2')
    dur = branch(p['emb_dur'][xs[:, 2]], 'fc3')
    point = jnp.concatenate([loc, arr, dur], axis=1) @ p['fc4_w'] + p['fc4_b']    # [t,16]

    def cell(x, d):   # one GRU-cell step with h_prev = 0 (seq_len == 1)
        r = jax.nn.sigmoid(x @ p[f'gru_{d}_wir'] + p[f'gru_{d}_bir'] + p[f'gru_{d}_bhr'])
        z = jax.nn.sigmoid(x @ p[f'gru_{d}_wiz'] + p[f'gru_{d}_biz'] + p[f'gru_{d}_bhz'])
        n = jnp.tanh(x @ p[f'gru_{d}_win'] + p[f'gru_{d}_bin'] + r * p[f'gru_{d}_bhn'])
        return (1.0 - z) * n

    hf, hr = cell(point, 'f'), cell(point, 'r')
    out = jnp.concatenate([hf, hr], axis=1)                                        # GRU out
    s = jax.nn.sigmoid(out[t_len - 1] @ p['w5'][:, 0] + p['b5'][0])
    return s, hf


if __name__ == "__main__":
    key = jax.random.PRNGKey(0)
    kp, kl, kloc, karr, kdur = jax.random.split(key, 5)
    params = init_params(kp)
    packed = pack_params(params)

    # Small batch of trajectories: B=16, each padded to MAX_LEN=10, 3 id columns.
    B = 16
    lengths = jax.random.randint(kl, (B,), 1, MAX_LEN + 1)                    # t_len in [1, 10]
    loc_ids = jax.random.randint(kloc, (B, MAX_LEN), 1, POINT_SIZE)           # nonzero = valid
    arr_ids = jax.random.randint(karr, (B, MAX_LEN), 0, TIM_SIZE)
    dur_ids = jax.random.randint(kdur, (B, MAX_LEN), 0, TIM_SIZE)
    pad = jnp.arange(MAX_LEN)[None, :] >= lengths[:, None]
    loc_ids = jnp.where(pad, 0, loc_ids)                                       # TrajLen stops at loc==0
    arr_ids = jnp.where(pad, 0, arr_ids)
    dur_ids = jnp.where(pad, 0, dur_ids)
    x = jnp.stack([loc_ids, arr_ids, dur_ids], axis=-1).astype(jnp.int32)      # [16, 10, 3]

    s, h, t_len = class_dis_forward(packed, x)
    s = s.block_until_ready(); h = h.block_until_ready(); t_len = t_len.block_until_ready()

    assert s.shape == (B,) and h.shape == (B, MAX_LEN, HID), (s.shape, h.shape)
    assert bool(jnp.all(jnp.isfinite(s))) and bool(jnp.all(jnp.isfinite(h)))
    assert bool(jnp.array_equal(t_len, lengths)), (t_len, lengths)

    # Compare against the f32 unfused reference (kernel uses bf16 matmul inputs -> loose tol).
    for i in range(B):
        t = int(lengths[i])
        s_ref, h_ref = class_dis_ref(params, x[i], t)
        assert bool(jnp.allclose(s[i], s_ref, atol=5e-2, rtol=5e-2)), (i, s[i], s_ref)
        assert bool(jnp.allclose(h[i, :t], h_ref, atol=5e-2, rtol=5e-2)), i

    print("KERNEL_OK")
</pallas_src>

<mosaic_0001>
module attributes {stable_mosaic.version = 11 : i64} {
  func.func @_class_dis_kernel(%arg0: i32, %arg1: memref<80x48xbf16, #tpu.memory_space<vmem>>, %arg2: memref<8x80xf32, #tpu.memory_space<vmem>>, %arg3: memref<48x48xbf16, #tpu.memory_space<vmem>>, %arg4: memref<1x48xf32, #tpu.memory_space<vmem>>, %arg5: memref<48x48xbf16, #tpu.memory_space<vmem>>, %arg6: memref<1x48xf32, #tpu.memory_space<vmem>>, %arg7: memref<48x16xbf16, #tpu.memory_space<vmem>>, %arg8: memref<1x16xf32, #tpu.memory_space<vmem>>, %arg9: memref<16x96xbf16, #tpu.memory_space<vmem>>, %arg10: memref<1x64xf32, #tpu.memory_space<vmem>>, %arg11: memref<1x32xf32, #tpu.memory_space<vmem>>, %arg12: memref<1x32xf32, #tpu.memory_space<vmem>>, %arg13: memref<32x1xbf16, #tpu.memory_space<vmem>>, %arg14: memref<1x1xf32, #tpu.memory_space<vmem>>, %arg15: memref<80x16xf32, #tpu.memory_space<vmem>>, %arg16: memref<8x1xf32, #tpu.memory_space<vmem>>) attributes {dimension_semantics = [#tpu.dimension_semantics<parallel>], iteration_bounds = array<i64: 2>, scalar_prefetch = 0 : i64, scratch_operands = 0 : i64, tpu.core_type = #tpu.core_type<tc>, window_params = [{transform_indices = @transform_0, window_bounds = array<i64: 80, 48>}, {transform_indices = @transform_1, window_bounds = array<i64: 8, 80>}, {pipeline_mode = #tpu.pipeline_mode<synchronous>, transform_indices = @transform_2, window_bounds = array<i64: 48, 48>}, {pipeline_mode = #tpu.pipeline_mode<synchronous>, transform_indices = @transform_3, window_bounds = array<i64: 1, 48>}, {pipeline_mode = #tpu.pipeline_mode<synchronous>, transform_indices = @transform_4, window_bounds = array<i64: 48, 48>}, {pipeline_mode = #tpu.pipeline_mode<synchronous>, transform_indices = @transform_5, window_bounds = array<i64: 1, 48>}, {pipeline_mode = #tpu.pipeline_mode<synchronous>, transform_indices = @transform_6, window_bounds = array<i64: 48, 16>}, {pipeline_mode = #tpu.pipeline_mode<synchronous>, transform_indices = @transform_7, window_bounds = array<i64: 1, 16>}, {pipeline_mode = #tpu.pipeline_mode<synchronous>, transform_indices = @transform_8, window_bounds = array<i64: 16, 96>}, {pipeline_mode = #tpu.pipeline_mode<synchronous>, transform_indices = @transform_9, window_bounds = array<i64: 1, 64>}, {pipeline_mode = #tpu.pipeline_mode<synchronous>, transform_indices = @transform_10, window_bounds = array<i64: 1, 32>}, {pipeline_mode = #tpu.pipeline_mode<synchronous>, transform_indices = @transform_11, window_bounds = array<i64: 1, 32>}, {pipeline_mode = #tpu.pipeline_mode<synchronous>, transform_indices = @transform_12, window_bounds = array<i64: 32, 1>}, {pipeline_mode = #tpu.pipeline_mode<synchronous>, transform_indices = @transform_13, window_bounds = array<i64: 1, 1>}, {transform_indices = @transform_14, window_bounds = array<i64: 80, 16>}, {transform_indices = @transform_15, window_bounds = array<i64: 8, 1>}]} {
    %c0 = arith.constant 0 : index
    %c0_0 = arith.constant 0 : index
    %0 = vector.load %arg1[%c0, %c0_0] : memref<80x48xbf16, #tpu.memory_space<vmem>>, vector<80x48xbf16>
    %1 = arith.extf %0 : vector<80x48xbf16> to vector<80x48xf32>
    %c0_1 = arith.constant 0 : index
    %c0_2 = arith.constant 0 : index
    %2 = vector.load %arg3[%c0_1, %c0_2] : memref<48x48xbf16, #tpu.memory_space<vmem>>, vector<48x48xbf16>
    %cst = arith.constant dense<0.000000e+00> : vector<80x48xf32>
    %3 = tpu.matmul %0, %2, %cst {dimension_numbers = #tpu.dot_dimension_numbers<[1], [0], [0], [1], [0, 0, 1, 1], [], []>} : vector<80x48xbf16>, vector<48x48xbf16>, vector<80x48xf32> -> vector<80x48xf32>
    %c0_3 = arith.constant 0 : index
    %c0_4 = arith.constant 0 : index
    %4 = vector.load %arg4[%c0_3, %c0_4] : memref<1x48xf32, #tpu.memory_space<vmem>>, vector<1x48xf32>
    %5 = vector.broadcast %4 : vector<1x48xf32> to vector<80x48xf32>
    %6 = arith.addf %3, %5 : vector<80x48xf32>
    %cst_5 = arith.constant 0.000000e+00 : f32
    %7 = vector.broadcast %cst_5 : f32 to vector<80x48xf32>
    %8 = arith.maximumf %6, %7 : vector<80x48xf32>
    %9 = arith.addf %1, %8 : vector<80x48xf32>
    %10 = arith.truncf %9 : vector<80x48xf32> to vector<80x48xbf16>
    %c0_6 = arith.constant 0 : index
    %c0_7 = arith.constant 0 : index
    %11 = vector.load %arg5[%c0_6, %c0_7] : memref<48x48xbf16, #tpu.memory_space<vmem>>, vector<48x48xbf16>
    %cst_8 = arith.constant dense<0.000000e+00> : vector<80x48xf32>
    %12 = tpu.matmul %10, %11, %cst_8 {dimension_numbers = #tpu.dot_dimension_numbers<[1], [0], [0], [1], [0, 0, 1, 1], [], []>} : vector<80x48xbf16>, vector<48x48xbf16>, vector<80x48xf32> -> vector<80x48xf32>
    %c0_9 = arith.constant 0 : index
    %c0_10 = arith.constant 0 : index
    %13 = vector.load %arg6[%c0_9, %c0_10] : memref<1x48xf32, #tpu.memory_space<vmem>>, vector<1x48xf32>
    %14 = vector.broadcast %13 : vector<1x48xf32> to vector<80x48xf32>
    %15 = arith.addf %12, %14 : vector<80x48xf32>
    %cst_11 = arith.constant 0.000000e+00 : f32
    %16 = vector.broadcast %cst_11 : f32 to vector<80x48xf32>
    %17 = arith.maximumf %15, %16 : vector<80x48xf32>
    %18 = arith.addf %9, %17 : vector<80x48xf32>
    %19 = arith.truncf %18 : vector<80x48xf32> to vector<80x48xbf16>
    %c0_12 = arith.constant 0 : index
    %c0_13 = arith.constant 0 : index
    %20 = vector.load %arg7[%c0_12, %c0_13] : memref<48x16xbf16, #tpu.memory_space<vmem>>, vector<48x16xbf16>
    %cst_14 = arith.constant dense<0.000000e+00> : vector<80x16xf32>
    %21 = tpu.matmul %19, %20, %cst_14 {dimension_numbers = #tpu.dot_dimension_numbers<[1], [0], [0], [1], [0, 0, 1, 1], [], []>} : vector<80x48xbf16>, vector<48x16xbf16>, vector<80x16xf32> -> vector<80x16xf32>
    %c0_15 = arith.constant 0 : index
    %c0_16 = arith.constant 0 : index
    %22 = vector.load %arg8[%c0_15, %c0_16] : memref<1x16xf32, #tpu.memory_space<vmem>>, vector<1x16xf32>
    %23 = vector.broadcast %22 : vector<1x16xf32> to vector<80x16xf32>
    %24 = arith.addf %21, %23 : vector<80x16xf32>
    %25 = arith.truncf %24 : vector<80x16xf32> to vector<80x16xbf16>
    %c0_17 = arith.constant 0 : index
    %c0_18 = arith.constant 0 : index
    %26 = vector.load %arg9[%c0_17, %c0_18] : memref<16x96xbf16, #tpu.memory_space<vmem>>, vector<16x96xbf16>
    %cst_19 = arith.constant dense<0.000000e+00> : vector<80x96xf32>
    %27 = tpu.matmul %25, %26, %cst_19 {dimension_numbers = #tpu.dot_dimension_numbers<[1], [0], [0], [1], [0, 0, 1, 1], [], []>} : vector<80x16xbf16>, vector<16x96xbf16>, vector<80x96xf32> -> vector<80x96xf32>
    %28 = vector.extract_strided_slice %27 {offsets = [0, 0], sizes = [80, 64], strides = [1, 1]} : vector<80x96xf32> to vector<80x64xf32>
    %c0_20 = arith.constant 0 : index
    %c0_21 = arith.constant 0 : index
    %29 = vector.load %arg10[%c0_20, %c0_21] : memref<1x64xf32, #tpu.memory_space<vmem>>, vector<1x64xf32>
    %30 = vector.broadcast %29 : vector<1x64xf32> to vector<80x64xf32>
    %31 = arith.addf %28, %30 : vector<80x64xf32>
    %32 = arith.negf %31 : vector<80x64xf32>
    %33 = math.exp %32 : vector<80x64xf32>
    %cst_22 = arith.constant 1.000000e+00 : f32
    %34 = vector.broadcast %cst_22 : f32 to vector<80x64xf32>
    %35 = arith.addf %34, %33 : vector<80x64xf32>
    %36 = arith.divf %34, %35 : vector<80x64xf32>
    %37 = vector.extract_strided_slice %36 {offsets = [0, 0], sizes = [80, 32], strides = [1, 1]} : vector<80x64xf32> to vector<80x32xf32>
    %38 = vector.extract_strided_slice %36 {offsets = [0, 32], sizes = [80, 32], strides = [1, 1]} : vector<80x64xf32> to vector<80x32xf32>
    %39 = vector.extract_strided_slice %27 {offsets = [0, 64], sizes = [80, 32], strides = [1, 1]} : vector<80x96xf32> to vector<80x32xf32>
    %c0_23 = arith.constant 0 : index
    %c0_24 = arith.constant 0 : index
    %40 = vector.load %arg11[%c0_23, %c0_24] : memref<1x32xf32, #tpu.memory_space<vmem>>, vector<1x32xf32>
    %41 = vector.broadcast %40 : vector<1x32xf32> to vector<80x32xf32>
    %42 = arith.addf %39, %41 : vector<80x32xf32>
    %c0_25 = arith.constant 0 : index
    %c0_26 = arith.constant 0 : index
    %43 = vector.load %arg12[%c0_25, %c0_26] : memref<1x32xf32, #tpu.memory_space<vmem>>, vector<1x32xf32>
    %44 = vector.broadcast %43 : vector<1x32xf32> to vector<80x32xf32>
    %45 = arith.mulf %37, %44 : vector<80x32xf32>
    %46 = arith.addf %42, %45 : vector<80x32xf32>
    %47 = math.tanh %46 : vector<80x32xf32>
    %cst_27 = arith.constant 1.000000e+00 : f32
    %48 = vector.broadcast %cst_27 : f32 to vector<80x32xf32>
    %49 = arith.subf %48, %38 : vector<80x32xf32>
    %50 = arith.mulf %49, %47 : vector<80x32xf32>
    %51 = vector.extract_strided_slice %50 {offsets = [0, 0], sizes = [80, 16], strides = [1, 1]} : vector<80x32xf32> to vector<80x16xf32>
    %c0_28 = arith.constant 0 : index
    %c0_29 = arith.constant 0 : index
    %52 = vector.load %arg15[%c0_28, %c0_29] : memref<80x16xf32, #tpu.memory_space<vmem>>, vector<80x16xf32>
    tpu.vector_store %arg15[%c0_28, %c0_29], %51 {strides = array<i32>} : memref<80x16xf32, #tpu.memory_space<vmem>>, vector<80x16xf32>,
    %c0_30 = arith.constant 0 : index
    %c0_31 = arith.constant 0 : index
    %53 = vector.load %arg2[%c0_30, %c0_31] : memref<8x80xf32, #tpu.memory_space<vmem>>, vector<8x80xf32>
    %54 = arith.truncf %53 : vector<8x80xf32> to vector<8x80xbf16>
    %55 = arith.truncf %50 : vector<80x32xf32> to vector<80x32xbf16>
    %cst_32 = arith.constant dense<0.000000e+00> : vector<8x32xf32>
    %56 = tpu.matmul %54, %55, %cst_32 {dimension_numbers = #tpu.dot_dimension_numbers<[1], [0], [0], [1], [0, 0, 1, 1], [], []>} : vector<8x80xbf16>, vector<80x32xbf16>, vector<8x32xf32> -> vector<8x32xf32>
    %57 = arith.truncf %56 : vector<8x32xf32> to vector<8x32xbf16>
    %c0_33 = arith.constant 0 : index
    %c0_34 = arith.constant 0 : index
    %58 = vector.load %arg13[%c0_33, %c0_34] : memref<32x1xbf16, #tpu.memory_space<vmem>>, vector<32x1xbf16>
    %cst_35 = arith.constant dense<0.000000e+00> : vector<8x1xf32>
    %59 = tpu.matmul %57, %58, %cst_35 {dimension_numbers = #tpu.dot_dimension_numbers<[1], [0], [0], [1], [0, 0, 1, 1], [], []>} : vector<8x32xbf16>, vector<32x1xbf16>, vector<8x1xf32> -> vector<8x1xf32>
    %c0_36 = arith.constant 0 : index
    %c0_37 = arith.constant 0 : index
    %60 = vector.load %arg14[%c0_36, %c0_37] : memref<1x1xf32, #tpu.memory_space<vmem>>, vector<1x1xf32>
    %61 = vector.broadcast %60 : vector<1x1xf32> to vector<8x1xf32>
    %62 = arith.addf %59, %61 : vector<8x1xf32>
    %63 = arith.negf %62 : vector<8x1xf32>
    %64 = math.exp %63 : vector<8x1xf32>
    %cst_38 = arith.constant 1.000000e+00 : f32
    %65 = vector.broadcast %cst_38 : f32 to vector<8x1xf32>
    %66 = arith.addf %65, %64 : vector<8x1xf32>
    %67 = arith.divf %65, %66 : vector<8x1xf32>
    %c0_39 = arith.constant 0 : index
    %c0_40 = arith.constant 0 : index
    %68 = vector.load %arg16[%c0_39, %c0_40] : memref<8x1xf32, #tpu.memory_space<vmem>>, vector<8x1xf32>
    tpu.vector_store %arg16[%c0_39, %c0_40], %67 {strides = array<i32>} : memref<8x1xf32, #tpu.memory_space<vmem>>, vector<8x1xf32>,
    return
  }
  func.func @transform_0(%arg0: i32) -> (i32, i32) {
    %c0_i32 = arith.constant 0 : i32
    %c0_i32_0 = arith.constant 0 : i32
    return %arg0, %c0_i32 : i32, i32
  }
  func.func @transform_1(%arg0: i32) -> (i32, i32) {
    %c0_i32 = arith.constant 0 : i32
    %c0_i32_0 = arith.constant 0 : i32
    return %arg0, %c0_i32 : i32, i32
  }
  func.func @transform_2(%arg0: i32) -> (i32, i32) {
    %c0_i32 = arith.constant 0 : i32
    %c0_i32_0 = arith.constant 0 : i32
    %c0_i32_1 = arith.constant 0 : i32
    return %c0_i32, %c0_i32_0 : i32, i32
  }
  func.func @transform_3(%arg0: i32) -> (i32, i32) {
    %c0_i32 = arith.constant 0 : i32
    %c0_i32_0 = arith.constant 0 : i32
    %c0_i32_1 = arith.constant 0 : i32
    return %c0_i32, %c0_i32_0 : i32, i32
  }
  func.func @transform_4(%arg0: i32) -> (i32, i32) {
    %c0_i32 = arith.constant 0 : i32
    %c0_i32_0 = arith.constant 0 : i32
    %c0_i32_1 = arith.constant 0 : i32
    return %c0_i32, %c0_i32_0 : i32, i32
  }
  func.func @transform_5(%arg0: i32) -> (i32, i32) {
    %c0_i32 = arith.constant 0 : i32
    %c0_i32_0 = arith.constant 0 : i32
    %c0_i32_1 = arith.constant 0 : i32
    return %c0_i32, %c0_i32_0 : i32, i32
  }
  func.func @transform_6(%arg0: i32) -> (i32, i32) {
    %c0_i32 = arith.constant 0 : i32
    %c0_i32_0 = arith.constant 0 : i32
    %c0_i32_1 = arith.constant 0 : i32
    return %c0_i32, %c0_i32_0 : i32, i32
  }
  func.func @transform_7(%arg0: i32) -> (i32, i32) {
    %c0_i32 = arith.constant 0 : i32
    %c0_i32_0 = arith.constant 0 : i32
    %c0_i32_1 = arith.constant 0 : i32
    return %c0_i32, %c0_i32_0 : i32, i32
  }
  func.func @transform_8(%arg0: i32) -> (i32, i32) {
    %c0_i32 = arith.constant 0 : i32
    %c0_i32_0 = arith.constant 0 : i32
    %c0_i32_1 = arith.constant 0 : i32
    return %c0_i32, %c0_i32_0 : i32, i32
  }
  func.func @transform_9(%arg0: i32) -> (i32, i32) {
    %c0_i32 = arith.constant 0 : i32
    %c0_i32_0 = arith.constant 0 : i32
    %c0_i32_1 = arith.constant 0 : i32
    return %c0_i32, %c0_i32_0 : i32, i32
  }
  func.func @transform_10(%arg0: i32) -> (i32, i32) {
    %c0_i32 = arith.constant 0 : i32
    %c0_i32_0 = arith.constant 0 : i32
    %c0_i32_1 = arith.constant 0 : i32
    return %c0_i32, %c0_i32_0 : i32, i32
  }
  func.func @transform_11(%arg0: i32) -> (i32, i32) {
    %c0_i32 = arith.constant 0 : i32
    %c0_i32_0 = arith.constant 0 : i32
    %c0_i32_1 = arith.constant 0 : i32
    return %c0_i32, %c0_i32_0 : i32, i32
  }
  func.func @transform_12(%arg0: i32) -> (i32, i32) {
    %c0_i32 = arith.constant 0 : i32
    %c0_i32_0 = arith.constant 0 : i32
    %c0_i32_1 = arith.constant 0 : i32
    return %c0_i32, %c0_i32_0 : i32, i32
  }
  func.func @transform_13(%arg0: i32) -> (i32, i32) {
    %c0_i32 = arith.constant 0 : i32
    %c0_i32_0 = arith.constant 0 : i32
    %c0_i32_1 = arith.constant 0 : i32
    return %c0_i32, %c0_i32_0 : i32, i32
  }
  func.func @transform_14(%arg0: i32) -> (i32, i32) {
    %c0_i32 = arith.constant 0 : i32
    %c0_i32_0 = arith.constant 0 : i32
    return %arg0, %c0_i32 : i32, i32
  }
  func.func @transform_15(%arg0: i32) -> (i32, i32) {
    %c0_i32 = arith.constant 0 : i32
    %c0_i32_0 = arith.constant 0 : i32
    return %arg0, %c0_i32 : i32, i32
  }
}

</mosaic_0001>

<bundles_post_ra>
// kernel: class_dis_forward.1
= control target key start
LH: loop header
LB: loop body
LE: loop exit
PB: predicated region body
PF: predicated region fallthrough
CT: control target
= control target key end

     0   :  { %s1828_s20 = smov 0   ;;  %s2239_s0 = inlined_call_operand.vmem [shape: bf16[160,48], index: 0, kind: input, shape index: {}]   ;;  %s2240_s1 = inlined_call_operand.vmem [shape: f32[16,80], index: 1, kind: input, shape index: {}]   ;;  %s2241_s2 = inlined_call_operand.vmem [shape: bf16[48,48], index: 2, kind: input, shape index: {}]   ;;  %s2242_s3 = inlined_call_operand.vmem [shape: f32[1,48], index: 3, kind: input, shape index: {}]   ;;  %s2243_s4 = inlined_call_operand.vmem [shape: bf16[48,48], index: 4, kind: input, shape index: {}]   ;;  %s2244_s5 = inlined_call_operand.vmem [shape: f32[1,48], index: 5, kind: input, shape index: {}]   ;;  %s2245_s6 = inlined_call_operand.vmem [shape: bf16[48,16], index: 6, kind: input, shape index: {}]   ;;  %s2246_s7 = inlined_call_operand.vmem [shape: f32[1,16], index: 7, kind: input, shape index: {}]   ;;  %s2247_s8 = inlined_call_operand.vmem [shape: bf16[16,96], index: 8, kind: input, shape index: {}]   ;;  %s2248_s9 = inlined_call_operand.vmem [shape: f32[1,64], index: 9, kind: input, shape index: {}]   ;;  %s2249_s10 = inlined_call_operand.vmem [shape: f32[1,32], index: 10, kind: input, shape index: {}]   ;;  %s2250_s11 = inlined_call_operand.vmem [shape: f32[1,32], index: 11, kind: input, shape index: {}]   ;;  %s2251_s12 = inlined_call_operand.vmem [shape: bf16[32,1], index: 12, kind: input, shape index: {}]   ;;  %s2252_s13 = inlined_call_operand.<no memory space> [shape: f32[1,1], index: 13, kind: input, shape index: {}]   ;;  %s2253_s14 = inlined_call_operand.vmem [shape: f32[160,16], index: 14, kind: output, shape index: {0}]   ;;  %s2254_s15 = inlined_call_operand.vmem [shape: f32[16,1], index: 15, kind: output, shape index: {1}]  }
   0x1   :  { %v21_v0 = vstv %s2252_s13 }
   0x2   :  { %22 = vst [vmem:[#allocation2] sm:$0x1] %v21_v0 }
   0x3 LB: > { %s1834_s21 = sadd.s32 4294967295, %s1741_s20   ;;  %p1529_p0 = scmp.ge.s32.totalorder %s1741_s20, 1  ;;  %s1741_s20 = sphi %s1828_s20, %s28_s20  }
   0x4   : > { %p452_p1 = scmp.lt.s32.totalorder %s1741_s20, 3 }
   0x6   : > { %p453_p2 = pnand %p1529_p0, %p452_p1 }
   0x7   : > { %s508_s13 = smul.u32 (!%p453_p2), 10, %s1834_s21  ;;  %s1743_s26 = smov (!%p453_p2), 64  }
   0x8   : > { %456 = sbr.rel (%p453_p2) target bundleno = 1362 (0x552), region = 76  ;;  %s1744_s18 = smov (!%p453_p2), 96  }
   0x9   : > { %p509_p3 = scmp.lt.s32.totalorder (!%p453_p2), %s508_s13, 19  ;;  %p514_p4 = scmp.lt.s32.totalorder (!%p453_p2), %s1834_s21, 1 }
   0xd   : > { %v1644_v1 = vld [vmem:[%s2241_s2 + $0x10] sm:$0xff]  ;;  %v1643_v2 = vld [vmem:[%s2241_s2 + $0x8] sm:$0xff]  ;;  %s2260_s13 = smov (!%p509_p3, %s508_s13), 19  ;;  %v1642_v3 = vld [vmem:[%s2241_s2] sm:$0xff]  ;;  %vm602_vm0 = vcmask 392192   ;;  %vm869_vm1 = vcmask 130048  }
   0xe   : > { %623 = vmatpush.bf16.msra.mxu0 %v1644_v1  ;;  %s1530_s28 = sshll.u32 %s2260_s13, 2  ;;  %v1647_v9 = vld [vmem:[%s2243_s4 + $0x10] sm:$0xff]  ;;  %v1646_v10 = vld [vmem:[%s2243_s4 + $0x8] sm:$0xff]  ;;  %v1645_v11 = vld [vmem:[%s2243_s4] sm:$0xff]  ;;  %s1532_s19 = sshll.u32 %s2260_s13, 3 }
   0xf   : > { %s1854_s16 = scalar_lea.vmem %s2239_s0, %s1530_s28  ;;  %725 = vmatpush.bf16.msra.mxu1 %v1647_v9  ;;  %v1664_v13 = vld [vmem:[%s2242_s3] ss:$0 sm:$0xff]  ;;  %v1650_v9 = vld [vmem:[%s2245_s6 + $0x10] sm:$0xff]  ;;  %s2193_s24 = scalar_lea.vmem %s2253_s14, %s1532_s19 }
  0x10   : > { %v1637_v4 = vld [vmem:[%s1854_s16] sm:$0xff]  ;;  %v1638_v5 = vld [vmem:[%s1854_s16 + $0x8] sm:$0xff]  ;;  %v1639_v6 = vld [vmem:[%s1854_s16 + $0x10] sm:$0xff]  ;;  %827 = vmatpush.bf16.msra.mxu2 %v1650_v9  ;;  %s2262_s21 = smov (!%p514_p4, %s1834_s21), 1 }
  0x11   : > { %v1640_v7 = vld [vmem:[%s1854_s16 + $0x18] sm:$0xff]  ;;  %v1641_v8 = vld [vmem:[%s1854_s16 + $0x20] sm:$0xff]  ;;  %v531_v27 = vld [vmem:[%s1854_s16 + $0x8] sm:$0xff]  }
  0x12   : > { %624 = vmatpush.bf16.msra.mxu0 %v1643_v2  ;;  %v529_v15 = vld [vmem:[%s1854_s16] sm:$0xff]   ;;  %v541_v29 = vunpack.c.l.bf16 %v531_v27  ;;  %v542_v31 = vunpack.c.h.bf16 %v531_v27  ;;  %v533_v39 = vld [vmem:[%s1854_s16 + $0x10] sm:$0xff]   ;;  %v535_v51 = vld [vmem:[%s1854_s16 + $0x18] sm:$0xff]  }
  0x13   : > { %726 = vmatpush.bf16.msra.mxu1 %v1646_v10  ;;  %v539_v17 = vunpack.c.l.bf16 %v529_v15  ;;  %v540_v19 = vunpack.c.h.bf16 %v529_v15  ;;  %v543_v41 = vunpack.c.l.bf16 %v533_v39  ;;  %v544_v43 = vunpack.c.h.bf16 %v533_v39  ;;  %v537_v63 = vld [vmem:[%s1854_s16 + $0x20] sm:$0xff]   ;;  %v1649_v10 = vld [vmem:[%s2245_s6 + $0x8] sm:$0xff] }
  0x14   : > { %v545_v53 = vunpack.c.l.bf16 %v535_v51  ;;  %v546_v55 = vunpack.c.h.bf16 %v535_v51  ;;  %v547_v1 = vunpack.c.l.bf16 %v537_v63  ;;  %828 = vmatpush.bf16.msra.mxu2 %v1649_v10 }
  0x16   : > { %625 = vmatpush.bf16.msra.mxu0 %v1642_v3  ;;  %v548_v3 = vunpack.c.h.bf16 %v537_v63 }
  0x17   : > { %727 = vmatpush.bf16.msra.mxu1 %v1645_v11  ;;  %v1648_v11 = vld [vmem:[%s2245_s6] sm:$0xff] }
  0x18   : > { %829 = vmatpush.bf16.msra.mxu2 %v1648_v11 }
  0x19   : > { %1566 = vmatmul.msk.bf16.vlgmr.msra.gmra.mxu0 %vm602_vm0, %v1637_v4 }
  0x29   : > { %1567 = vmatmul.msk.bf16.gmra.mxu0 %vm602_vm0, %v1638_v5 }
  0x39   : > { %1568 = vmatmul.msk.bf16.gmra.mxu0 %vm602_vm0, %v1639_v6 }
  0x49   : > { %1569 = vmatmul.msk.bf16.gmra.mxu0 %vm602_vm0, %v1640_v7 }
  0x59   : > { %1570 = vmatmul.msk.bf16.gmra.mxu0 %vm602_vm0, %v1641_v8 }
  0x96   : > { %v627_v12 = vpop.f32.mrf.mxu0 }
  0x97   : > { %v628_v14 = vadd.f32 %v1664_v13, %v627_v12 }
  0x99   : > { %v652_v18 = vmax.f32 %v628_v14, 0.0 }
  0x9b   : > { %v1879_v22 = vadd.f32 %v652_v18, %v539_v17 }
  0x9e   : > { %v629_v16 = vpop.f32.mrf.mxu0 }
  0x9f   : > { %v630_v20 = vadd.f32 %v1664_v13, %v629_v16 }
  0xa1   : > { %v653_v21 = vmax.f32 %v630_v20, 0.0 }
  0xa3   : > { %v1881_v23 = vadd.f32 %v653_v21, %v540_v19 }
  0xa5   : > { %v672_v24 = vpack.c.bf16 %v1881_v23, %v1879_v22 }
  0xa6   : > { %v632_v25 = vpop.f32.mrf.mxu0 }
  0xa7   : > { %1583 = vmatmul.msk.bf16.vlgmr.msra.gmra.mxu1 %vm602_vm0, %v672_v24  ;;  %v633_v26 = vadd.f32 %v1664_v13, %v632_v25 }
  0xa9   : > { %v654_v30 = vmax.f32 %v633_v26, 0.0 }
  0xab   : > { %v1887_v34 = vadd.f32 %v654_v30, %v541_v29 }
  0xae   : > { %v634_v28 = vpop.f32.mrf.mxu0 }
  0xaf   : > { %v635_v32 = vadd.f32 %v1664_v13, %v634_v28 }
  0xb1   : > { %v655_v33 = vmax.f32 %v635_v32, 0.0 }
  0xb3   : > { %v1889_v35 = vadd.f32 %v655_v33, %v542_v31 }
  0xb5   : > { %v673_v36 = vpack.c.bf16 %v1889_v35, %v1887_v34 }
  0xb6   : > { %v637_v37 = vpop.f32.mrf.mxu0 }
  0xb7   : > { %1584 = vmatmul.msk.bf16.gmra.mxu1 %vm602_vm0, %v673_v36  ;;  %v638_v38 = vadd.f32 %v1664_v13, %v637_v37 }
  0xb9   : > { %v656_v42 = vmax.f32 %v638_v38, 0.0 }
  0xbb   : > { %v1895_v46 = vadd.f32 %v656_v42, %v543_v41 }
  0xbe   : > { %v639_v40 = vpop.f32.mrf.mxu0 }
  0xbf   : > { %v640_v44 = vadd.f32 %v1664_v13, %v639_v40 }
  0xc1   : > { %v657_v45 = vmax.f32 %v640_v44, 0.0 }
  0xc3   : > { %v1897_v47 = vadd.f32 %v657_v45, %v544_v43 }
  0xc5   : > { %v674_v48 = vpack.c.bf16 %v1897_v47, %v1895_v46 }
  0xc6   : > { %v642_v49 = vpop.f32.mrf.mxu0 }
  0xc7   : > { %1585 = vmatmul.msk.bf16.gmra.mxu1 %vm602_vm0, %v674_v48  ;;  %v643_v50 = vadd.f32 %v1664_v13, %v642_v49 }
  0xc9   : > { %v658_v54 = vmax.f32 %v643_v50, 0.0 }
  0xcb   : > { %v668_v58 = vadd.f32 %v658_v54, %v545_v53 }
  0xce   : > { %v644_v52 = vpop.f32.mrf.mxu0 }
  0xcf   : > { %v645_v56 = vadd.f32 %v1664_v13, %v644_v52 }
  0xd1   : > { %v659_v57 = vmax.f32 %v645_v56, 0.0 }
  0xd3   : > { %v669_v59 = vadd.f32 %v659_v57, %v546_v55 }
  0xd5   : > { %v675_v60 = vpack.c.bf16 %v669_v59, %v668_v58 }
  0xd6   : > { %v647_v61 = vpop.f32.mrf.mxu0 }
  0xd7   : > { %1586 = vmatmul.msk.bf16.gmra.mxu1 %vm602_vm0, %v675_v60  ;;  %v648_v62 = vadd.f32 %v1664_v13, %v647_v61  ;;  %v1651_v60 = vld [vmem:[%s2247_s8] sm:$0xff] }
  0xd8   : > { %892 = vmatpush.bf16.msra.mxu3 %v1651_v60  ;;  %v1666_v61 = vld [vmem:[%s2246_s7] ss:$0 sm:$0xff] }
  0xd9   : > { %v660_v2 = vmax.f32 %v648_v62, 0.0 }
  0xdb   : > { %v670_v6 = vadd.f32 %v660_v2, %v547_v1 }
  0xde   : > { %v649_v0 = vpop.f32.mrf.mxu0 }
  0xdf   : > { %v650_v4 = vadd.f32 %v1664_v13, %v649_v0  ;;  %v1665_v13 = vld [vmem:[%s2244_s5] ss:$0 sm:$0xff] }
  0xe1   : > { %v661_v5 = vmax.f32 %v650_v4, 0.0 }
  0xe3   : > { %v671_v7 = vadd.f32 %v661_v5, %v548_v3 }
  0xe5   : > { %v676_v8 = vpack.c.bf16 %v671_v7, %v670_v6 }
  0xe7   : > { %1587 = vmatmul.msk.bf16.gmra.mxu1 %vm602_vm0, %v676_v8 }
 0x124   : > { %v729_v12 = vpop.f32.mrf.mxu1 }
 0x125   : > { %v730_v14 = vadd.f32 %v1665_v13, %v729_v12 }
 0x127   : > { %v754_v16 = vmax.f32 %v730_v14, 0.0 }
 0x129   : > { %v764_v19 = vadd.f32 %v754_v16, %v1879_v22 }
 0x12c   : > { %v731_v15 = vpop.f32.mrf.mxu1 }
 0x12d   : > { %v732_v17 = vadd.f32 %v1665_v13, %v731_v15 }
 0x12f   : > { %v755_v18 = vmax.f32 %v732_v17, 0.0 }
 0x131   : > { %v765_v20 = vadd.f32 %v755_v18, %v1881_v23 }
 0x133   : > { %v774_v21 = vpack.c.bf16 %v765_v20, %v764_v19 }
 0x134   : > { %v734_v24 = vpop.f32.mrf.mxu1 }
 0x135   : > { %1600 = vmatmul.msk.bf16.vlgmr.msra.gmra.mxu2 %vm602_vm0, %v774_v21  ;;  %v735_v25 = vadd.f32 %v1665_v13, %v734_v24 }
 0x137   : > { %v756_v27 = vmax.f32 %v735_v25, 0.0 }
 0x139   : > { %v766_v30 = vadd.f32 %v756_v27, %v1887_v34 }
 0x13c   : > { %v736_v26 = vpop.f32.mrf.mxu1 }
 0x13d   : > { %v737_v28 = vadd.f32 %v1665_v13, %v736_v26 }
 0x13f   : > { %v757_v29 = vmax.f32 %v737_v28, 0.0  ;;  %v1955_v28 = vld [vmem:[%s2248_s9] ss:$0 sm:$0xff] }
 0x141   : > { %v767_v31 = vadd.f32 %v757_v29, %v1889_v35 }
 0x143   : > { %v775_v32 = vpack.c.bf16 %v767_v31, %v766_v30 }
 0x144   : > { %v739_v33 = vpop.f32.mrf.mxu1 }
 0x145   : > { %1601 = vmatmul.msk.bf16.gmra.mxu2 %vm602_vm0, %v775_v32  ;;  %v740_v22 = vadd.f32 %v1665_v13, %v739_v33 }
 0x147   : > { %v758_v23 = vmax.f32 %v740_v22, 0.0 }
 0x149   : > { %v768_v39 = vadd.f32 %v758_v23, %v1895_v46 }
 0x14c   : > { %v741_v36 = vpop.f32.mrf.mxu1 }
 0x14d   : > { %v742_v37 = vadd.f32 %v1665_v13, %v741_v36 }
 0x14f   : > { %v759_v38 = vmax.f32 %v742_v37, 0.0 }
 0x151   : > { %v769_v40 = vadd.f32 %v759_v38, %v1897_v47 }
 0x153   : > { %v776_v41 = vpack.c.bf16 %v769_v40, %v768_v39 }
 0x154   : > { %v744_v42 = vpop.f32.mrf.mxu1 }
 0x155   : > { %1602 = vmatmul.msk.bf16.gmra.mxu2 %vm602_vm0, %v776_v41  ;;  %v745_v34 = vadd.f32 %v1665_v13, %v744_v42 }
 0x157   : > { %v760_v35 = vmax.f32 %v745_v34, 0.0 }
 0x159   : > { %v770_v48 = vadd.f32 %v760_v35, %v668_v58  ;;  %v1667_v58 = vld [vmem:[%s2249_s10] ss:$0 sm:$0xff] }
 0x15a   : > { %1126 = vrot.lane.b32.xlu0 %v1667_v58, %s1743_s26  ;;  %v1984_v58 = vld [vmem:[%s2250_s11] ss:$0 sm:$0xff] }
 0x15c   : > { %v746_v43 = vpop.f32.mrf.mxu1 }
 0x15d   : > { %v747_v44 = vadd.f32 %v1665_v13, %v746_v43 }
 0x15f   : > { %v761_v45 = vmax.f32 %v747_v44, 0.0 }
 0x161   : > { %v771_v49 = vadd.f32 %v761_v45, %v669_v59 }
 0x163   : > { %v777_v50 = vpack.c.bf16 %v771_v49, %v770_v48 }
 0x164   : > { %v749_v51 = vpop.f32.mrf.mxu1 }
 0x165   : > { %1603 = vmatmul.msk.bf16.gmra.mxu2 %vm602_vm0, %v777_v50  ;;  %v750_v52 = vadd.f32 %v1665_v13, %v749_v51 }
 0x167   : > { %v762_v46 = vmax.f32 %v750_v52, 0.0 }
 0x169   : > { %v772_v55 = vadd.f32 %v762_v46, %v670_v6 }
 0x16c   : > { %v751_v53 = vpop.f32.mrf.mxu1 }
 0x16d   : > { %v752_v54 = vadd.f32 %v1665_v13, %v751_v53 }
 0x16f   : > { %v763_v47 = vmax.f32 %v752_v54, 0.0 }
 0x171   : > { %v773_v56 = vadd.f32 %v763_v47, %v671_v7 }
 0x173   : > { %v778_v57 = vpack.c.bf16 %v773_v56, %v772_v55 }
 0x175   : > { %1604 = vmatmul.msk.bf16.gmra.mxu2 %vm602_vm0, %v778_v57 }
 0x1b8   : > { %v831_v59 = vpop.f32.mrf.mxu2 }
 0x1b9   : > { %v832_v63 = vadd.f32 %v1666_v61, %v831_v59 }
 0x1c0   : > { %v833_v62 = vpop.f32.mrf.mxu2 }
 0x1c1   : > { %v834_v0 = vadd.f32 %v1666_v61, %v833_v62 }
 0x1c3   : > { %v856_v1 = vpack.c.bf16 %v834_v0, %v832_v63 }
 0x1c5   : > { %1609 = vmatmul.msk.bf16.vlgmr.msra.gmra.mxu3 %vm869_vm1, %v856_v1 }
 0x1c8   : > { %v836_v2 = vpop.f32.mrf.mxu2 }
 0x1c9   : > { %v837_v4 = vadd.f32 %v1666_v61, %v836_v2 }
 0x1d0   : > { %v838_v3 = vpop.f32.mrf.mxu2 }
 0x1d1   : > { %v839_v5 = vadd.f32 %v1666_v61, %v838_v3 }
 0x1d3   : > { %v857_v6 = vpack.c.bf16 %v839_v5, %v837_v4 }
 0x1d5   : > { %1610 = vmatmul.msk.bf16.gmra.mxu3 %vm869_vm1, %v857_v6 }
 0x1d8   : > { %v841_v7 = vpop.f32.mrf.mxu2 }
 0x1d9   : > { %v842_v9 = vadd.f32 %v1666_v61, %v841_v7 }
 0x1e0   : > { %v843_v8 = vpop.f32.mrf.mxu2 }
 0x1e1   : > { %v844_v10 = vadd.f32 %v1666_v61, %v843_v8 }
 0x1e3   : > { %v858_v11 = vpack.c.bf16 %v844_v10, %v842_v9 }
 0x1e5   : > { %1611 = vmatmul.msk.bf16.gmra.mxu3 %vm869_vm1, %v858_v11 }
 0x1e8   : > { %v846_v12 = vpop.f32.mrf.mxu2 }
 0x1e9   : > { %v847_v14 = vadd.f32 %v1666_v61, %v846_v12 }
 0x1f0   : > { %v848_v13 = vpop.f32.mrf.mxu2 }
 0x1f1   : > { %v849_v15 = vadd.f32 %v1666_v61, %v848_v13 }
 0x1f3   : > { %v859_v16 = vpack.c.bf16 %v849_v15, %v847_v14 }
 0x1f5   : > { %1612 = vmatmul.msk.bf16.gmra.mxu3 %vm869_vm1, %v859_v16 }
 0x1f8   : > { %v851_v17 = vpop.f32.mrf.mxu2 }
 0x1f9   : > { %v852_v19 = vadd.f32 %v1666_v61, %v851_v17 }
 0x200   : > { %v853_v18 = vpop.f32.mrf.mxu2 }
 0x201   : > { %v854_v20 = vadd.f32 %v1666_v61, %v853_v18 }
 0x203   : > { %v860_v21 = vpack.c.bf16 %v854_v20, %v852_v19 }
 0x205   : > { %1613 = vmatmul.msk.bf16.gmra.mxu3 %vm869_vm1, %v860_v21 }
 0x248   : > { %v1944_v24 = vpop.f32.mrf.mxu3 }
 0x249   : > { %v923_v42 = vadd.f32 %v1955_v28, %v1944_v24 }
 0x24b   : > { %v1614_v45 = vmul.f32 -1.442695, %v923_v42 }
 0x250   : > { %v1946_v25 = vpop.f32.mrf.mxu3 }
 0x251   : > { %v924_v62 = vadd.f32 %v1955_v28, %v1946_v25 }
 0x253   : > { %v1615_v5 = vmul.f32 -1.442695, %v924_v62 }
 0x258   : > { %v1948_v26 = vpop.f32.mrf.mxu3 }
 0x259   : > { %v925_v53 = vadd.f32 %v1955_v28, %v1948_v26 }
 0x25b   : > { %v1616_v59 = vmul.f32 -1.442695, %v925_v53 }
 0x260   : > { %v1950_v27 = vpop.f32.mrf.mxu3 }
 0x261   : > { %v926_v33 = vadd.f32 %v1955_v28, %v1950_v27 }
 0x263   : > { %v1617_v23 = vmul.f32 -1.442695, %v926_v33 }
 0x268   : > { %v1957_v29 = vpop.f32.mrf.mxu3 }
 0x269   : > { %v927_v30 = vadd.f32 %v1955_v28, %v1957_v29 }
 0x26b   : > { %v1618_v31 = vmul.f32 -1.442695, %v927_v30 }
 0x26d   : > { %1671 = vpow2.f32 %v1618_v31 }
 0x270   : > { %v1961_v32 = vpop.f32.mrf.mxu3 }
 0x271   : > { %v928_v39 = vadd.f32 %v1955_v28, %v1961_v32 }
 0x273   : > { %v1672_v22 = vpop.eup %1671  ;;  %v1619_v35 = vmul.f32 -1.442695, %v928_v39 }
 0x274   : > { %v967_v36 = vadd.f32 1.0, %v1672_v22 }
 0x276   : > { %1673 = vrcp.f32 %v967_v36  ;;  %v1044_v49 = vand.u32 2147483648, %v967_v36  ;;  %v1042_v52 = vand.u32 2147483647, %v967_v36  ;;  %vm1038_vm3 = vweird.f32 %v967_v36 }
 0x277   : > { %1675 = vpow2.f32 %v1617_v23 }
 0x278   : > { %v1965_v37 = vpop.f32.mrf.mxu3  ;;  %v1045_v57 = vor.u32 1.1754944e-38, %v1044_v49  ;;  %vm1043_vm5 = vcmp.eq.f32.partialorder %v1042_v52, 8.507059e+37 }
 0x279   : > { %v929_v38 = vadd.f32 %v1955_v28, %v1965_v37 }
 0x27b   : > { %v1620_v40 = vmul.f32 -1.442695, %v929_v38 }
 0x27c   : > { %v1674_v41 = vpop.eup %1673 }
 0x27d   : > { %1677 = vpow2.f32 %v1620_v40  ;;  %v1034_v34 = vmul.f32 %v1674_v41, %v967_v36  ;;  %v1676_v43 = vpop.eup %1675  ;;  %vm1039_vm2 = vweird.f32 %v1674_v41 }
 0x27e   : > { %v1979_v46 = vadd.f32 1.0, %v1676_v43  ;;  %1679 = vpow2.f32 %v1619_v35  ;;  %vm1040_vm4 = vmor %vm1038_vm3, %vm1039_vm2 }
 0x27f   : > { %v1035_v44 = vsub.f32 1.0, %v1034_v34  ;;  %1681 = vpow2.f32 %v1614_v45 }
 0x280   : > { %v1973_v48 = vpop.f32.mrf.mxu3  ;;  %vm1023_vm15 = vweird.f32 %v1979_v46 }
 0x281   : > { %v930_v50 = vadd.f32 %v1955_v28, %v1973_v48  ;;  %v1036_v51 = vmul.f32 %v1674_v41, %v1035_v44 }
 0x283   : > { %v1678_v54 = vpop.eup %1677  ;;  %v1621_v47 = vmul.f32 -1.442695, %v930_v50  ;;  %v1037_v55 = vadd.f32 %v1674_v41, %v1036_v51 }
 0x284   : > { %v969_v56 = vadd.f32 1.0, %v1678_v54  ;;  %v1680_v1 = vpop.eup %1679 }
 0x285   : > { %1683 = vpow2.f32 %v1621_v47  ;;  %v1041_v60 = vsel %vm1040_vm4, %v1674_v41, %v1037_v55  ;;  %v1682_v3 = vpop.eup %1681  ;;  %v1998_v8 = vadd.f32 1.0, %v1680_v1 }
 0x286   : > { %1685 = vrcp.f32 %v969_v56  ;;  %v1986_v61 = vsel %vm1043_vm5, %v1045_v57, %v1041_v60  ;;  %v2002_v12 = vadd.f32 1.0, %v1682_v3  ;;  %v1074_v16 = vand.u32 2147483648, %v969_v56 }
 0x287   : > { %1687 = vrcp.f32 %v1979_v46  ;;  %v1147_v63 = vmul.f32 %v1984_v58, %v1986_v61  ;;  %v1072_v20 = vand.u32 2147483647, %v969_v56  ;;  %vm1068_vm7 = vweird.f32 %v969_v56 }
 0x288   : > { %v1993_v0 = vpop.f32.mrf.mxu3  ;;  %1689 = vpow2.f32 %v1616_v59  ;;  %v1075_v23 = vor.u32 1.1754944e-38, %v1074_v16  ;;  %v1029_v3 = vand.u32 2147483648, %v1979_v46 }
 0x289   : > { %v931_v2 = vadd.f32 %v1955_v28, %v1993_v0  ;;  %1171 = vrot.lane.b32.xlu2 %v1147_v63, %s1743_s26  ;;  %vm1073_vm9 = vcmp.eq.f32.partialorder %v1072_v20, 8.507059e+37 }
 0x28b   : > { %v1684_v4 = vpop.eup %1683  ;;  %v1622_v6 = vmul.f32 -1.442695, %v931_v2 }
 0x28c   : > { %v1686_v7 = vpop.eup %1685  ;;  %v970_v9 = vadd.f32 1.0, %v1684_v4 }
 0x28d   : > { %v2000_v10 = vpop.eup %1687  ;;  %1691 = vpow2.f32 %v1622_v6  ;;  %v1064_v11 = vmul.f32 %v1686_v7, %v969_v56  ;;  %vm1069_vm6 = vweird.f32 %v1686_v7  ;;  %v1027_v6 = vand.u32 2147483647, %v1979_v46 }
 0x28e   : > { %1693 = vrcp.f32 %v970_v9  ;;  %v1690_v14 = vpop.eup %1689  ;;  %v1019_v17 = vmul.f32 %v2000_v10, %v1979_v46  ;;  %vm1070_vm8 = vmor %vm1068_vm7, %vm1069_vm6  ;;  %v1089_v44 = vand.u32 2147483648, %v970_v9  ;;  %v1087_v50 = vand.u32 2147483647, %v970_v9 }
 0x28f   : > { %1695 = vpow2.f32 %v1615_v5  ;;  %v1065_v13 = vsub.f32 1.0, %v1064_v11  ;;  %v2012_v30 = vadd.f32 1.0, %v1690_v14  ;;  %vm1083_vm11 = vweird.f32 %v970_v9 }
 0x290   : > { %1697 = vrcp.f32 %v1998_v8  ;;  %v2005_v15 = vpop.f32.mrf.mxu3  ;;  %v1020_v38 = vsub.f32 1.0, %v1019_v17  ;;  %v1090_v57 = vor.u32 1.1754944e-38, %v1089_v44  ;;  %vm1024_vm13 = vweird.f32 %v2000_v10 }
 0x291   : > { %v932_v18 = vadd.f32 %v1955_v28, %v2005_v15  ;;  %v1066_v19 = vmul.f32 %v1686_v7, %v1065_v13  ;;  %1699 = vrcp.f32 %v2002_v12  ;;  %vm1088_vm14 = vcmp.eq.f32.partialorder %v1087_v50, 8.507059e+37  ;;  %vm2049_vm0 = vmor %vm1023_vm15, %vm1024_vm13 }
 0x292   : > { %v1021_v45 = vmul.f32 %v2000_v10, %v1020_v38  ;;  %vm1028_vm3 = vcmp.eq.f32.partialorder %v1027_v6, 8.507059e+37  ;;  %v1014_v5 = vand.u32 2147483648, %v2012_v30 }
 0x293   : > { %v1692_v21 = vpop.eup %1691  ;;  %v1623_v31 = vmul.f32 -1.442695, %v932_v18  ;;  %v1067_v33 = vadd.f32 %v1686_v7, %v1066_v19  ;;  %v1030_v18 = vor.u32 1.1754944e-38, %v1029_v3 }
 0x294   : > { %v1694_v22 = vpop.eup %1693  ;;  %v2014_v36 = vadd.f32 1.0, %v1692_v21  ;;  %v1022_v60 = vadd.f32 %v2000_v10, %v1021_v45 }
 0x295   : > { %v1696_v39 = vpop.eup %1695  ;;  %1701 = vpow2.f32 %v1623_v31  ;;  %v1071_v28 = vsel %vm1070_vm8, %v1686_v7, %v1067_v33  ;;  %v1079_v40 = vmul.f32 %v1694_v22, %v970_v9  ;;  %vm1084_vm10 = vweird.f32 %v1694_v22 }
 0x296   : > { %v2016_v41 = vpop.eup %1697  ;;  %1703 = vrcp.f32 %v2014_v36  ;;  %v2019_v42 = vsel %vm1073_vm9, %v1075_v23, %v1071_v28  ;;  %v2030_v53 = vadd.f32 1.0, %v1696_v39  ;;  %vm1085_vm12 = vmor %vm1083_vm11, %vm1084_vm10  ;;  %v1026_v9 = vsel %vm2049_vm0, %v2000_v10, %v1022_v60 }
 0x297   : > { %1705 = vrcp.f32 %v2012_v30  ;;  %v1149_v34 = vmul.f32 %v1984_v58, %v2019_v42  ;;  %v1080_v43 = vsub.f32 1.0, %v1079_v40  ;;  %v2024_v35 = vpop.eup %1699  ;;  %v1049_v51 = vmul.f32 %v2016_v41, %v1998_v8 }
 0x298   : > { %v974_v47 = vmul.f32 %v2024_v35, %v2002_v12  ;;  %v1104_v11 = vand.u32 2147483648, %v2014_v36  ;;  %v1102_v16 = vand.u32 2147483647, %v2014_v36  ;;  %vm1098_vm4 = vweird.f32 %v2014_v36 }
 0x299   : > { %1175 = vrot.lane.b32.xlu1 %v1149_v34, %s1743_s26  ;;  %v1081_v49 = vmul.f32 %v1694_v22, %v1080_v43  ;;  %v1050_v1 = vsub.f32 1.0, %v1049_v51  ;;  %v2064_v20 = vsel %vm1028_vm3, %v1030_v18, %v1026_v9  ;;  %vm1054_vm6 = vweird.f32 %v2016_v41 }
 0x29a   : > { %v975_v19 = vsub.f32 1.0, %v974_v47  ;;  %v1105_v21 = vor.u32 1.1754944e-38, %v1104_v11  ;;  %vm1103_vm7 = vcmp.eq.f32.partialorder %v1102_v16, 8.507059e+37  ;;  %vm1053_vm8 = vweird.f32 %v1998_v8 }
 0x29b   : > { %v1702_v52 = vpop.eup %1701  ;;  %v1082_v54 = vadd.f32 %v1694_v22, %v1081_v49  ;;  %v1051_v17 = vmul.f32 %v2016_v41, %v1050_v1  ;;  %v1146_v28 = vmul.f32 %v1984_v58, %v2064_v20  ;;  %v1057_v34 = vand.u32 2147483647, %v1998_v8  ;;  %vm2080_vm9 = vmor %vm1053_vm8, %vm1054_vm6 }
 0x29c   : > { %v1704_v55 = vpop.eup %1703  ;;  %v2034_v56 = vadd.f32 1.0, %v1702_v52  ;;  %v976_v49 = vmul.f32 %v2024_v35, %v975_v19  ;;  %vm978_vm11 = vweird.f32 %v2002_v12  ;;  %v1012_v9 = vand.u32 2147483647, %v2012_v30 }
 0x29d   : > { %v2038_v59 = vpop.eup %1705  ;;  %v1086_v62 = vsel %vm1085_vm12, %v1694_v22, %v1082_v54  ;;  %v1094_v63 = vmul.f32 %v1704_v55, %v2014_v36  ;;  %vm1099_vm2 = vweird.f32 %v1704_v55  ;;  %v1052_v23 = vadd.f32 %v2016_v41, %v1051_v17 }
 0x29e   : > { %1707 = vrcp.f32 %v2034_v56  ;;  %v2042_v2 = vsel %vm1088_vm14, %v1090_v57, %v1086_v62  ;;  %v1004_v13 = vmul.f32 %v2038_v59, %v2012_v30  ;;  %vm1100_vm5 = vmor %vm1098_vm4, %vm1099_vm2  ;;  %v1059_v36 = vand.u32 2147483648, %v1998_v8 }
 0x29f   : > { %1709 = vrcp.f32 %v2030_v53  ;;  %v1150_v4 = vmul.f32 %v1984_v58, %v2042_v2  ;;  %v1095_v7 = vsub.f32 1.0, %v1094_v63  ;;  %v1119_v45 = vand.u32 2147483648, %v2034_v56 }
 0x2a0   : > { %v1005_v31 = vsub.f32 1.0, %v1004_v13  ;;  %v1056_v8 = vsel %vm2080_vm9, %v2016_v41, %v1052_v23  ;;  %v1117_v54 = vand.u32 2147483647, %v2034_v56  ;;  %v1060_v47 = vor.u32 1.1754944e-38, %v1059_v36 }
 0x2a1   : > { %1177 = vrot.lane.b32.xlu2 %v1150_v4, %s1743_s26  ;;  %v1096_v14 = vmul.f32 %v1704_v55, %v1095_v7  ;;  %vm1058_vm12 = vcmp.eq.f32.partialorder %v1057_v34, 8.507059e+37  ;;  %vm1113_vm13 = vweird.f32 %v2034_v56  ;;  %vm979_vm14 = vweird.f32 %v2024_v35 }
 0x2a2   : > { %v1006_v50 = vmul.f32 %v2038_v59, %v1005_v31  ;;  %v2098_v57 = vsel %vm1058_vm12, %v1060_v47, %v1056_v8  ;;  %v1120_v60 = vor.u32 1.1754944e-38, %v1119_v45  ;;  %v977_v62 = vadd.f32 %v2024_v35, %v976_v49  ;;  %vm980_vm3 = vmor %vm978_vm11, %vm979_vm14 }
 0x2a3   : > { %v1097_v46 = vadd.f32 %v1704_v55, %v1096_v14  ;;  %vm1118_vm0 = vcmp.eq.f32.partialorder %v1117_v54, 8.507059e+37  ;;  %vm1009_vm2 = vweird.f32 %v2038_v59  ;;  %v982_v4 = vand.u32 2147483647, %v2002_v12 }
 0x2a4   : > { %v1708_v10 = vpop.eup %1707  ;;  %v1007_v1 = vadd.f32 %v2038_v59, %v1006_v50  ;;  %v1148_v6 = vmul.f32 %v1984_v58, %v2098_v57  ;;  %vm1008_vm4 = vweird.f32 %v2012_v30  ;;  %v981_v11 = vsel %vm980_vm3, %v2024_v35, %v977_v62 }
 0x2a5   : > { %v2067_v33 = vpop.eup %1709  ;;  %v1101_v22 = vsel %vm1100_vm5, %v1704_v55, %v1097_v46  ;;  %v1109_v38 = vmul.f32 %v1708_v10, %v2034_v56  ;;  %vm1114_vm10 = vweird.f32 %v1708_v10  ;;  %v984_v56 = vand.u32 2147483648, %v2002_v12  ;;  %vm1010_vm5 = vmor %vm1008_vm4, %vm1009_vm2 }
 0x2a6   : > { %v2071_v39 = vsel %vm1103_vm7, %v1105_v21, %v1101_v22  ;;  %v989_v51 = vmul.f32 %v2067_v33, %v2030_v53  ;;  %vm1115_vm15 = vmor %vm1113_vm13, %vm1114_vm10  ;;  %v1011_v13 = vsel %vm1010_vm5, %v2038_v59, %v1007_v1  ;;  %v1015_v17 = vor.u32 1.1754944e-38, %v1014_v5 }
 0x2a7   : > { %v1151_v40 = vmul.f32 %v1984_v58, %v2071_v39  ;;  %v1110_v43 = vsub.f32 1.0, %v1109_v38  ;;  %v985_v16 = vor.u32 1.1754944e-38, %v984_v56  ;;  %vm983_vm6 = vcmp.eq.f32.partialorder %v982_v4, 8.507059e+37  ;;  %v1127_v38 = vpop.permute.xlu0 %1126 }
 0x2a8   : > { %v990_v41 = vsub.f32 1.0, %v989_v51  ;;  %vm1013_vm7 = vcmp.eq.f32.partialorder %v1012_v9, 8.507059e+37  ;;  %vm994_vm8 = vweird.f32 %v2067_v33  ;;  %v999_v46 = vand.u32 2147483648, %v2030_v53 }
 0x2a9   : > { %1169 = vrot.lane.b32.xlu2 %v1146_v28, %s1743_s26  ;;  %1179 = vrot.lane.b32.xlu0 %v1151_v40, %s1743_s26  ;;  %v1111_v52 = vmul.f32 %v1708_v10, %v1110_v43  ;;  %v2123_v12 = vsel %vm983_vm6, %v985_v16, %v981_v11  ;;  %v2125_v18 = vsel %vm1013_vm7, %v1015_v17, %v1011_v13  ;;  %vm993_vm9 = vweird.f32 %v2030_v53 }
 0x2aa   : > { %v991_v14 = vmul.f32 %v2067_v33, %v990_v41  ;;  %v1143_v35 = vmul.f32 %v1984_v58, %v2123_v12  ;;  %v1145_v59 = vmul.f32 %v1984_v58, %v2125_v18  ;;  %v997_v19 = vand.u32 2147483647, %v2030_v53  ;;  %vm995_vm10 = vmor %vm993_vm9, %vm994_vm8 }
 0x2ab   : > { %v1112_v55 = vadd.f32 %v1708_v10, %v1111_v52  ;;  %v1000_v21 = vor.u32 1.1754944e-38, %v999_v46  ;;  %v1136_v53 = vadd.f32 %v1127_v38, %v1973_v48  ;;  %v1134_v48 = vadd.f32 %v1127_v38, %v1961_v32 }
 0x2ac   : > { %v992_v30 = vadd.f32 %v2067_v33, %v991_v14  ;;  %vm998_vm11 = vcmp.eq.f32.partialorder %v997_v19, 8.507059e+37  ;;  %v1138_v50 = vadd.f32 %v1127_v38, %v2005_v15  ;;  %v1133_v47 = vadd.f32 %v1127_v38, %v1957_v29 }
 0x2ad   : > { %v1116_v63 = vsel %vm1115_vm15, %v1708_v10, %v1112_v55  ;;  %v1132_v4 = vadd.f32 %v1127_v38, %v1950_v27  ;;  %v1220_v27 = vsub.f32 1.0, %v2042_v2  ;;  %v1219_v14 = vsub.f32 1.0, %v2019_v42 }
 0x2ae   : > { %v2103_v3 = vsel %vm1118_vm0, %v1120_v60, %v1116_v63  ;;  %v996_v10 = vsel %vm995_vm10, %v2067_v33, %v992_v30  ;;  %v1135_v33 = vadd.f32 %v1127_v38, %v1965_v37  ;;  %v1131_v60 = vadd.f32 %v1127_v38, %v1948_v26 }
 0x2af   : > { %v1152_v7 = vmul.f32 %v1984_v58, %v2103_v3  ;;  %v2139_v31 = vsel %vm998_vm11, %v1000_v21, %v996_v10  ;;  %v1221_v19 = vsub.f32 1.0, %v2071_v39  ;;  %v1222_v10 = vsub.f32 1.0, %v2103_v3 }
 0x2b0   : > { %v1144_v22 = vmul.f32 %v1984_v58, %v2139_v31  ;;  %v1137_v58 = vadd.f32 %v1127_v38, %v1993_v0  ;;  %v1129_v0 = vadd.f32 %v1127_v38, %v1944_v24  ;;  %v1130_v24 = vadd.f32 %v1127_v38, %v1946_v25 }
 0x2b1   : > { %1173 = vrot.lane.b32.xlu0 %v1148_v6, %s1743_s26  ;;  %1181 = vrot.lane.b32.xlu1 %v1152_v7, %s1743_s26  ;;  %v1214_v42 = vsub.f32 1.0, %v2139_v31  ;;  %v1215_v31 = vsub.f32 1.0, %v2125_v18  ;;  %vm1350_vm12 = vcmask 654336   ;;  %vm1388_vm13 = vcmask 261120  }
 0x2b2   : > { %vm1424_vm0 = vcmask 7168  }
 0x2b9   : > { %1163 = vrot.lane.b32.xlu0 %v1143_v35, %s1743_s26  ;;  %1167 = vrot.lane.b32.xlu1 %v1145_v59, %s1743_s26 }
 0x2c1   : > { %1165 = vrot.lane.b32.xlu1 %v1144_v22, %s1743_s26  ;;  %s1531_s26 = sshll.u32 %s2262_s21, 3 }
 0x2c2   : > { %s517_s16 = scalar_lea.vmem %s2240_s1, %s1531_s26  ;;  %s527_s19 = scalar_lea.vmem %s2254_s15, %s1531_s26 }
 0x2e3   : > { %v1172_v23 = vpop.permute.xlu2 %1171 }
 0x2e4   : > { %v1197_v55 = vadd.f32 %v1172_v23, %v1133_v47  ;;  %v1652_v47 = vld [vmem:[%s2251_s12] sm:$0xff] }
 0x2fb   : > { %v1178_v36 = vpop.permute.xlu2 %1177 }
 0x2fc   : > { %v1200_v28 = vadd.f32 %v1178_v36, %v1136_v53  ;;  %v1213_v36 = vsub.f32 1.0, %v2123_v12  ;;  %v1216_v12 = vsub.f32 1.0, %v2064_v20 }
 0x2fe   : > { %1711 = vtanh.f32 %v1200_v28  ;;  %v1218_v28 = vsub.f32 1.0, %v2098_v57 }
 0x303   : > { %v1170_v29 = vpop.permute.xlu2 %1169 }
 0x304   : > { %v1712_v40 = vpop.eup %1711  ;;  %v1196_v26 = vadd.f32 %v1170_v29, %v1132_v4 }
 0x305   : > { %1247 = vrot.lane.b32.xlu2 %v1712_v40, %s1744_s18  ;;  %v1217_v40 = vsub.f32 1.0, %v1986_v61 }
 0x30b   : > { %v1176_v34 = vpop.permute.xlu1 %1175 }
 0x30c   : > { %v1199_v43 = vadd.f32 %v1176_v34, %v1135_v33 }
 0x30e   : > { %1713 = vtanh.f32 %v1199_v43 }
 0x314   : > { %v1714_v44 = vpop.eup %1713 }
 0x315   : > { %1245 = vrot.lane.b32.xlu1 %v1714_v44, %s1744_s18 }
 0x31b   : > { %v1180_v45 = vpop.permute.xlu0 %1179 }
 0x31c   : > { %v1201_v49 = vadd.f32 %v1180_v45, %v1137_v58 }
 0x31e   : > { %1715 = vtanh.f32 %v1201_v49 }
 0x323   : > { %v1174_v51 = vpop.permute.xlu0 %1173  ;;  %v1182_v8 = vpop.permute.xlu1 %1181 }
 0x324   : > { %v1716_v52 = vpop.eup %1715  ;;  %v1198_v54 = vadd.f32 %v1174_v51, %v1134_v48  ;;  %v1202_v37 = vadd.f32 %v1182_v8, %v1138_v50 }
 0x325   : > { %1249 = vrot.lane.b32.xlu2 %v1716_v52, %s1744_s18 }
 0x326   : > { %1717 = vtanh.f32 %v1198_v54 }
 0x327   : > { %1719 = vtanh.f32 %v1202_v37  ;;  %v1653_v37 = vld [vmem:[%s2251_s12 + $0x8] sm:$0xff] }
 0x328   : > { %1721 = vtanh.f32 %v1197_v55  ;;  %1398 = vmatpush.bf16.msrb.mxu0 %v1653_v37 }
 0x32b   : > { %v1164_v62 = vpop.permute.xlu0 %1163  ;;  %v1168_v32 = vpop.permute.xlu1 %1167 }
 0x32c   : > { %v1718_v41 = vpop.eup %1717  ;;  %v1193_v15 = vadd.f32 %v1164_v62, %v1129_v0  ;;  %v1195_v63 = vadd.f32 %v1168_v32, %v1131_v60  ;;  %1399 = vmatpush.bf16.msrb.mxu0 %v1652_v47  ;;  %v1323_v62 = vld [vmem:[%s517_s16] sm:$0xff] }
 0x32d   : > { %v1720_v1 = vpop.eup %1719  ;;  %1243 = vrot.lane.b32.xlu1 %v1718_v41, %s1744_s18  ;;  %v1324_v32 = vpack.c.bf16 %v1323_v62, %v1323_v62 }
 0x32e   : > { %1723 = vtanh.f32 %v1193_v15  ;;  %1251 = vrot.lane.b32.xlu0 %v1720_v1, %s1744_s18  ;;  %v1722_v56 = vpop.eup %1721 }
 0x32f   : > { %1725 = vtanh.f32 %v1195_v63 }
 0x333   : > { %v1166_v5 = vpop.permute.xlu1 %1165 }
 0x334   : > { %v1724_v6 = vpop.eup %1723  ;;  %v1194_v7 = vadd.f32 %v1166_v5, %v1130_v24 }
 0x335   : > { %v1726_v9 = vpop.eup %1725  ;;  %1233 = vrot.lane.b32.xlu1 %v1724_v6, %s1744_s18 }
 0x336   : > { %1727 = vtanh.f32 %v1194_v7  ;;  %1241 = vrot.lane.b32.xlu0 %v1722_v56, %s1744_s18  ;;  %1237 = vrot.lane.b32.xlu2 %v1726_v9, %s1744_s18 }
 0x337   : > { %1729 = vtanh.f32 %v1196_v26  ;;  %v1670_v26 = vld [vmem:[#allocation2] ss:$0 sm:$0xff] }
 0x33c   : > { %v1728_v11 = vpop.eup %1727 }
 0x33d   : > { %v1730_v13 = vpop.eup %1729 }
 0x33e   : > { %1239 = vrot.lane.b32.xlu0 %v1730_v13, %s1744_s18  ;;  %1235 = vrot.lane.b32.xlu2 %v1728_v11, %s1744_s18 }
 0x35f   : > { %v1248_v25 = vpop.permute.xlu2 %1247 }
 0x360   : > { %v1270_v17 = vmul.f32 %v1248_v25, %v1220_v27 }
 0x37f   : > { %v1250_v35 = vpop.permute.xlu2 %1249 }
 0x380   : > { %v1271_v23 = vmul.f32 %v1250_v35, %v1221_v19 }
 0x387   : > { %v1246_v16 = vpop.permute.xlu1 %1245 }
 0x388   : > { %v1269_v30 = vmul.f32 %v1246_v16, %v1219_v14 }
 0x38a   : > { %v1328_v46 = vpack.c.bf16 %v1270_v17, %v1269_v30 }
 0x38c   : > { %1341 = vrot.lane.b32.xlu1 %v1328_v46, %s1744_s18 }
 0x390   : > { %v1238_v59 = vpop.permute.xlu2 %1237 }
 0x391   : > { %v1265_v57 = vmul.f32 %v1238_v59, %v1215_v31 }
 0x398   : > { %v1236_v2 = vpop.permute.xlu2 %1235 }
 0x399   : > { %v1264_v39 = vmul.f32 %v1236_v2, %v1214_v42 }
 0x39f   : > { %v1244_v21 = vpop.permute.xlu1 %1243 }
 0x3a0   : > { %v1252_v22 = vpop.permute.xlu0 %1251  ;;  %v1268_v43 = vmul.f32 %v1244_v21, %v1218_v28 }
 0x3a1   : > { %v1272_v38 = vmul.f32 %v1252_v22, %v1222_v10 }
 0x3a3   : > { %v1329_v53 = vpack.c.bf16 %v1272_v38, %v1271_v23 }
 0x3a5   : > { %1343 = vrot.lane.b32.xlu0 %v1329_v53, %s1744_s18 }
 0x3a7   : > { %v1234_v33 = vpop.permute.xlu1 %1233 }
 0x3a8   : > { %v1242_v34 = vpop.permute.xlu0 %1241  ;;  %v1263_v3 = vmul.f32 %v1234_v33, %v1213_v36 }
 0x3a9   : > { %v1267_v44 = vmul.f32 %v1242_v34, %v1217_v40 }
 0x3aa   : > { %v1325_v58 = vpack.c.bf16 %v1264_v39, %v1263_v3 }
 0x3ab   : > { %v1327_v45 = vpack.c.bf16 %v1268_v43, %v1267_v44 }
 0x3ac   : > { %1335 = vrot.lane.b32.xlu1 %v1325_v58, %s1744_s18 }
 0x3ad   : > { %1339 = vrot.lane.b32.xlu2 %v1327_v45, %s1744_s18 }
 0x3b0   : > { %v1240_v49 = vpop.permute.xlu0 %1239 }
 0x3b1   : > { %v1266_v61 = vmul.f32 %v1240_v49, %v1216_v12 }
 0x3b3   : > { %v1326_v48 = vpack.c.bf16 %v1266_v61, %v1265_v57 }
 0x3b4   : > { %1287 = vrot.lane.b32.xlu1 %v1265_v57, %s1744_s18 }
 0x3b5   : > { %1337 = vrot.lane.b32.xlu0 %v1326_v48, %s1744_s18  ;;  %1283 = vrot.lane.b32.xlu2 %v1263_v3, %s1744_s18 }
 0x3bc   : > { %1293 = vrot.lane.b32.xlu1 %v1268_v43, %s1744_s18 }
 0x3bd   : > { %1285 = vrot.lane.b32.xlu0 %v1264_v39, %s1744_s18  ;;  %1289 = vrot.lane.b32.xlu2 %v1266_v61, %s1744_s18 }
 0x3c4   : > { %1299 = vrot.lane.b32.xlu1 %v1271_v23, %s1744_s18 }
 0x3c5   : > { %1291 = vrot.lane.b32.xlu0 %v1267_v44, %s1744_s18  ;;  %1295 = vrot.lane.b32.xlu2 %v1269_v30, %s1744_s18 }
 0x3cd   : > { %1297 = vrot.lane.b32.xlu0 %v1270_v17, %s1744_s18  ;;  %1301 = vrot.lane.b32.xlu2 %v1272_v38, %s1744_s18 }
 0x3fe   : > { %v1342_v50 = vpop.permute.xlu1 %1341 }
 0x407   : > { %v1340_v20 = vpop.permute.xlu2 %1339 }
 0x40f   : > { %v1284_v18 = vpop.permute.xlu2 %1283 }
 0x410   : > { %1313 = vst.msk [vmem:[%s2193_s24] sm:$0xff] %vm869_vm1, %v1284_v18 }
 0x417   : > { %v1344_v51 = vpop.permute.xlu0 %1343  ;;  %v1290_v8 = vpop.permute.xlu2 %1289 }
 0x418   : > { %1316 = vst.msk [vmem:[%s2193_s24 + $0x18] sm:$0xff] %vm869_vm1, %v1290_v8  ;;  %1357 = vmatpush.bf16.msrb.mxu3 %v1344_v51 }
 0x41c   : > { %1358 = vmatpush.bf16.msrb.mxu3 %v1342_v50 }
 0x41e   : > { %v1336_v52 = vpop.permute.xlu1 %1335 }
 0x41f   : > { %v1296_v54 = vpop.permute.xlu2 %1295 }
 0x420   : > { %1319 = vst.msk [vmem:[%s2193_s24 + $0x30] sm:$0xff] %vm869_vm1, %v1296_v54  ;;  %1359 = vmatpush.bf16.msrb.mxu3 %v1340_v20 }
 0x426   : > { %v1288_v55 = vpop.permute.xlu1 %1287 }
 0x427   : > { %v1338_v0 = vpop.permute.xlu0 %1337  ;;  %v1302_v60 = vpop.permute.xlu2 %1301  ;;  %1315 = vst.msk [vmem:[%s2193_s24 + $0x10] sm:$0xff] %vm869_vm1, %v1288_v55 }
 0x428   : > { %1322 = vst.msk [vmem:[%s2193_s24 + $0x48] sm:$0xff] %vm869_vm1, %v1302_v60  ;;  %1360 = vmatpush.bf16.msrb.mxu3 %v1338_v0 }
 0x42c   : > { %1361 = vmatpush.bf16.msrb.mxu3 %v1336_v52 }
 0x42e   : > { %v1294_v41 = vpop.permute.xlu1 %1293 }
 0x42f   : > { %v1286_v15 = vpop.permute.xlu0 %1285  ;;  %1318 = vst.msk [vmem:[%s2193_s24 + $0x28] sm:$0xff] %vm869_vm1, %v1294_v41  ;;  %1624 = vmatmul.msk.bf16.vlgmr.msrb.gmra.mxu3 %vm1350_vm12, %v1324_v32 }
 0x430   : > { %1314 = vst.msk [vmem:[%s2193_s24 + $0x8] sm:$0xff] %vm869_vm1, %v1286_v15 }
 0x436   : > { %v1300_v63 = vpop.permute.xlu1 %1299 }
 0x437   : > { %v1292_v1 = vpop.permute.xlu0 %1291  ;;  %1321 = vst.msk [vmem:[%s2193_s24 + $0x40] sm:$0xff] %vm869_vm1, %v1300_v63 }
 0x438   : > { %1317 = vst.msk [vmem:[%s2193_s24 + $0x20] sm:$0xff] %vm869_vm1, %v1292_v1 }
 0x43f   : > { %v1298_v29 = vpop.permute.xlu0 %1297 }
 0x440   : > { %1320 = vst.msk [vmem:[%s2193_s24 + $0x38] sm:$0xff] %vm869_vm1, %v1298_v29 }
 0x4b2   : > { %v1363_v4 = vpop.f32.mrf.mxu3 }
 0x4b3   : > { %v1367_v24 = vpack.c.bf16 %v1363_v4, %v1363_v4 }
 0x4b5   : > { %1633 = vmatmul.msk.bf16.vlgmr.msrb.gmra.mxu0 %vm1388_vm13, %v1367_v24 }
 0x4ba   : > { %v1365_v56 = vpop.f32.mrf.mxu3 }
 0x532   : > { %v1401_v5 = vpop.f32.mrf.mxu0 }
 0x533   : > { %v1402_v6 = vadd.f32 %v1670_v26, %v1401_v5 }
 0x535   : > { %v1634_v7 = vmul.f32 -1.442695, %v1402_v6 }
 0x537   : > { %1731 = vpow2.f32 %v1634_v7 }
 0x53a   : > { %v1403_v9 = vpop.f32.mrf.mxu0 }
 0x53d   : > { %v1732_v11 = vpop.eup %1731 }
 0x53e   : > { %v1408_v13 = vadd.f32 1.0, %v1732_v11 }
 0x540   : > { %1733 = vrcp.f32 %v1408_v13  ;;  %v1420_v16 = vand.u32 2147483648, %v1408_v13  ;;  %v1418_v30 = vand.u32 2147483647, %v1408_v13  ;;  %vm1414_vm14 = vweird.f32 %v1408_v13 }
 0x542   : > { %v1421_v35 = vor.u32 1.1754944e-38, %v1420_v16  ;;  %vm1419_vm2 = vcmp.eq.f32.partialorder %v1418_v30, 8.507059e+37 }
 0x546   : > { %v1734_v25 = vpop.eup %1733 }
 0x547   : > { %v1410_v27 = vmul.f32 %v1734_v25, %v1408_v13  ;;  %vm1415_vm1 = vweird.f32 %v1734_v25 }
 0x548   : > { %vm1416_vm15 = vmor %vm1414_vm14, %vm1415_vm1 }
 0x549   : > { %v1411_v14 = vsub.f32 1.0, %v1410_v27 }
 0x54b   : > { %v1412_v17 = vmul.f32 %v1734_v25, %v1411_v14 }
 0x54d   : > { %v1413_v46 = vadd.f32 %v1734_v25, %v1412_v17 }
 0x54f   : > { %v1417_v59 = vsel %vm1416_vm15, %v1734_v25, %v1413_v46 }
 0x550   : > { %v1422_v19 = vsel %vm1419_vm2, %v1421_v35, %v1417_v59 }
 0x551   : > { %1425 = vst.msk [vmem:[%s527_s19] sm:$0xff] %vm1424_vm0, %v1422_v19 }
 0x552 PF: > { %s28_s20 = sadd.s32 1, %s1741_s20  }
 0x553   : > { %p25_p5 = scmp.ge.s32.totalorder %s28_s20, 4  }
 0x555   :  { %27 = sbr.rel (!%p25_p5) target bundleno = 3 (0x3), region = 121 }

</bundles_post_ra>
